<compile_context>
chip_gen: v7x
topology: tpu7x:2x2x1
jax: 0.10.0
libtpu: 0.0.40
codegen_flags: <defaults>
</compile_context>

<pallas_src>
import jax
import jax.numpy as jnp
from jax.experimental import pallas as pl
from jax.experimental.pallas import tpu as pltpu

SILU_SCALE = 1.0 / 0.6            # ScaledSiLU scale used by GemNet "silu"/"swish"
INV_SQRT_2 = 0.7071067811865476   # ResidualLayer 1/sqrt(2)


def _scaled_silu(v):
    return jax.nn.silu(v) * SILU_SCALE


def _round_up(x, m):
    return int(-(-int(x) // int(m)) * int(m))


def atom_update_kernel(id_ref, m_ref, rbf_ref, wrbf_ref, w1_ref, wres_ref,
                       out_ref, acc_ref):
    e = pl.program_id(1)
    n_e = pl.num_programs(1)

    @pl.when(e == 0)
    def _init():
        acc_ref[...] = jnp.zeros_like(acc_ref)

    # ---- per-edge-tile stage: dense_rbf (bf16 MXU) + f32 gate -------------
    mlp_rbf = jnp.dot(rbf_ref[...], wrbf_ref[...],
                      preferred_element_type=jnp.float32)        # (TE, De) f32
    x = m_ref[...].astype(jnp.float32) * mlp_rbf                 # f32 gate

    # ---- scatter-sum into this atom tile: small one-hot matmul on the MXU -
    tile_a = acc_ref.shape[0]
    tile_e = x.shape[0]
    a0 = pl.program_id(0) * tile_a
    atom_iota = jax.lax.broadcasted_iota(jnp.int32, (tile_a, tile_e), 0) + a0
    onehot = (atom_iota == id_ref[...]).astype(jnp.bfloat16)     # (TA, TE)
    acc_ref[...] += jnp.dot(onehot, x.astype(jnp.bfloat16),
                            preferred_element_type=jnp.float32)

    # ---- finalize (last edge tile only): MLP (scale already folded in W1) -
    @pl.when(e == n_e - 1)
    def _finalize():
        y = _scaled_silu(jnp.dot(acc_ref[...].astype(jnp.bfloat16), w1_ref[...],
                                 preferred_element_type=jnp.float32))
        n_hidden = wres_ref.shape[0] // 2                        # static
        for i in range(n_hidden):
            t = _scaled_silu(jnp.dot(y.astype(jnp.bfloat16), wres_ref[2 * i],
                                     preferred_element_type=jnp.float32))
            t = _scaled_silu(jnp.dot(t.astype(jnp.bfloat16), wres_ref[2 * i + 1],
                                     preferred_element_type=jnp.float32))
            y = (y + t) * INV_SQRT_2
        out_ref[...] = y.astype(out_ref.dtype)


def atom_update_block(h, m, rbf, id_j, w_rbf, w1, w_res, scale,
                      *, tile_a=256, tile_e=1024):
    """Tiled Pallas forward of AtomUpdateBlock.

    Weights are pre-transposed to (in, out). `scale` is the ScalingFactor
    scalar (inference path); it is folded into W1 on the host. Feature dims
    need not be multiples of 128; the wrapper pads to lane-dense widths and
    slices back.
    """
    n_atoms, emb_atom = h.shape
    n_edges, emb_edge = m.shape
    emb_rbf = rbf.shape[1]
    n_hidden = int(w_res.shape[0])

    # ---- tiling / padding --------------------------------------------------
    da_pad = _round_up(emb_atom, 128)          # lane-dense output width
    de_pad = _round_up(emb_edge, 128)          # lane-dense intermediate width
    tile_e = min(_round_up(tile_e, 128), _round_up(n_edges, 128))
    tile_a = min(_round_up(tile_a, 8), _round_up(n_atoms, 8))
    e_pad = _round_up(n_edges, tile_e)
    a_pad = _round_up(n_atoms, tile_a)
    n_at = a_pad // tile_a
    n_et = e_pad // tile_e

    # ---- host-side glue: pad + bf16 casts; fold ScalingFactor into W1 ------
    m_p = jnp.pad(m, ((0, e_pad - n_edges), (0, de_pad - emb_edge))
                  ).astype(jnp.bfloat16)
    rbf_p = jnp.pad(rbf, ((0, e_pad - n_edges), (0, 0))).astype(jnp.bfloat16)
    # padded edges point past every atom tile -> dropped by the one-hot
    id_p = jnp.pad(id_j.astype(jnp.int32), (0, e_pad - n_edges),
                   constant_values=a_pad).reshape(1, e_pad)
    w_rbf_p = jnp.pad(w_rbf, ((0, 0), (0, de_pad - emb_edge))
                      ).astype(jnp.bfloat16)
    scale_f32 = jnp.asarray(scale, dtype=jnp.float32)
    w1_p = jnp.pad(w1 * scale_f32,
                   ((0, de_pad - emb_edge), (0, da_pad - emb_atom))
                   ).astype(jnp.bfloat16)
    w_res_p = jnp.pad(
        w_res, ((0, 0), (0, 0), (0, da_pad - emb_atom), (0, da_pad - emb_atom))
    ).reshape(2 * n_hidden, da_pad, da_pad).astype(jnp.bfloat16)

    # ---- VMEM budget (double-buffered edge stream + resident weights) ------
    w_bytes = (emb_rbf * de_pad + de_pad * da_pad
               + 2 * n_hidden * da_pad * da_pad) * 2
    bytes_per_step = (
        2 * (tile_e * de_pad * 2 + tile_e * emb_rbf * 2 + tile_e * 4)  # streams
        + 2 * w_bytes                                                  # weights
        + 2 * tile_a * da_pad * 4                                      # output
        + tile_a * de_pad * 4                                          # scratch
        + tile_e * de_pad * 4 + tile_a * tile_e * 4                    # temps
    )
    vmem_limit = int(min(48 * 2**20, max(4 * bytes_per_step, 16 * 2**20)))

    cost = pl.CostEstimate(
        flops=int(n_at * 2 * e_pad * emb_rbf * de_pad
                  + 2 * a_pad * e_pad * de_pad
                  + 2 * a_pad * de_pad * da_pad
                  + n_hidden * 2 * 2 * a_pad * da_pad * da_pad),
        transcendentals=int(a_pad * da_pad * (1 + 2 * n_hidden)),
        bytes_accessed=int(n_at * e_pad * (de_pad * 2 + emb_rbf * 2 + 4)
                           + w_bytes + a_pad * da_pad * 4),
    )

    grid_spec = pltpu.PrefetchScalarGridSpec(
        num_scalar_prefetch=0,
        grid=(n_at, n_et),
        in_specs=[
            pl.BlockSpec((1, tile_e), lambda a, e: (0, e)),           # id_j
            pl.BlockSpec((tile_e, de_pad), lambda a, e: (e, 0)),      # m
            pl.BlockSpec((tile_e, emb_rbf), lambda a, e: (e, 0)),     # rbf
            pl.BlockSpec((emb_rbf, de_pad), lambda a, e: (0, 0)),     # W_rbf
            pl.BlockSpec((de_pad, da_pad), lambda a, e: (0, 0)),      # W1*scale
            pl.BlockSpec((2 * n_hidden, da_pad, da_pad),
                         lambda a, e: (0, 0, 0)),                     # W_res
        ],
        out_specs=pl.BlockSpec((tile_a, da_pad), lambda a, e: (a, 0)),
        scratch_shapes=[pltpu.VMEM((tile_a, de_pad), jnp.float32)],
    )

    out_padded = pl.pallas_call(
        atom_update_kernel,
        out_shape=jax.ShapeDtypeStruct((a_pad, da_pad), jnp.float32),
        grid_spec=grid_spec,
        compiler_params=pltpu.CompilerParams(
            dimension_semantics=("parallel", "arbitrary"),
            vmem_limit_bytes=vmem_limit,
        ),
        cost_estimate=cost,
    )(id_p, m_p, rbf_p, w_rbf_p, w1_p, w_res_p)

    return out_padded[:n_atoms, :emb_atom]


def reference_forward(h, m, rbf, id_j, w_rbf, w1, w_res, scale):
    """Faithful f32 reference of the PyTorch module."""
    mlp_rbf = rbf @ w_rbf
    x = m * mlp_rbf
    x2 = jax.ops.segment_sum(x, id_j, num_segments=h.shape[0])
    y = x2 * scale
    y = _scaled_silu(y @ w1)
    for i in range(w_res.shape[0]):
        t = _scaled_silu(_scaled_silu(y @ w_res[i, 0]) @ w_res[i, 1])
        y = (y + t) * INV_SQRT_2
    return y


if __name__ == "__main__":
    # Small synthetic problem (multiple atom/edge tiles, non-aligned sizes).
    n_atoms = 40
    n_edges = 300
    emb_size_atom = 64
    emb_size_edge = 64
    emb_size_rbf = 16
    n_hidden = 2

    key = jax.random.PRNGKey(0)
    k_h, k_m, k_rbf, k_id, k_wrbf, k_w1, k_res = jax.random.split(key, 7)

    h = jax.random.normal(k_h, (n_atoms, emb_size_atom), jnp.float32)
    m = jax.random.normal(k_m, (n_edges, emb_size_edge), jnp.float32)
    rbf = jax.random.normal(k_rbf, (n_edges, emb_size_rbf), jnp.float32)
    id_j = jax.random.randint(k_id, (n_edges,), 0, n_atoms, jnp.int32)

    # Weights stored as (in, out) = W^T of torch Linear; bias=False throughout.
    w_rbf = 0.1 * jax.random.normal(k_wrbf, (emb_size_rbf, emb_size_edge), jnp.float32)
    w1 = 0.1 * jax.random.normal(k_w1, (emb_size_edge, emb_size_atom), jnp.float32)
    w_res = 0.1 * jax.random.normal(
        k_res, (n_hidden, 2, emb_size_atom, emb_size_atom), jnp.float32)
    scale_factor = 1.0  # ScalingFactor fitted value (inference path only)

    out = atom_update_block(h, m, rbf, id_j, w_rbf, w1, w_res, scale_factor,
                            tile_a=16, tile_e=128)
    out = jax.block_until_ready(out)

    ref = reference_forward(h, m, rbf, id_j, w_rbf, w1, w_res, scale_factor)
    assert out.shape == (n_atoms, emb_size_atom)
    # bf16 matmuls (f32 accumulation) vs the f32 reference.
    max_err = float(jnp.max(jnp.abs(out - ref)))
    assert jnp.allclose(out, ref, atol=5e-2, rtol=5e-2), (
        f"mismatch vs reference, max abs err = {max_err}")

    print("KERNEL_OK")
</pallas_src>

<mosaic_0001>
module attributes {stable_mosaic.version = 11 : i64} {
  func.func @atom_update_kernel(%arg0: i32, %arg1: i32, %arg2: memref<1x128xi32, #tpu.memory_space<vmem>>, %arg3: memref<128x128xbf16, #tpu.memory_space<vmem>>, %arg4: memref<128x16xbf16, #tpu.memory_space<vmem>>, %arg5: memref<16x128xbf16, #tpu.memory_space<vmem>>, %arg6: memref<128x128xbf16, #tpu.memory_space<vmem>>, %arg7: memref<4x128x128xbf16, #tpu.memory_space<vmem>>, %arg8: memref<16x128xf32, #tpu.memory_space<vmem>>, %arg9: memref<16x128xf32, #tpu.memory_space<vmem>>) attributes {dimension_semantics = [#tpu.dimension_semantics<parallel>, #tpu.dimension_semantics<arbitrary>], iteration_bounds = array<i64: 3, 3>, scalar_prefetch = 0 : i64, scratch_operands = 1 : i64, tpu.core_type = #tpu.core_type<tc>, window_params = [{transform_indices = @transform_0, window_bounds = array<i64: 1, 128>}, {transform_indices = @transform_1, window_bounds = array<i64: 128, 128>}, {transform_indices = @transform_2, window_bounds = array<i64: 128, 16>}, {pipeline_mode = #tpu.pipeline_mode<synchronous>, transform_indices = @transform_3, window_bounds = array<i64: 16, 128>}, {pipeline_mode = #tpu.pipeline_mode<synchronous>, transform_indices = @transform_4, window_bounds = array<i64: 128, 128>}, {pipeline_mode = #tpu.pipeline_mode<synchronous>, transform_indices = @transform_5, window_bounds = array<i64: 4, 128, 128>}, {transform_indices = @transform_6, window_bounds = array<i64: 16, 128>}]} {
    %c0_i32 = arith.constant 0 : i32
    %0 = arith.cmpi eq, %arg1, %c0_i32 : i32
    %1 = arith.extui %0 : i1 to i32
    %c0_i32_0 = arith.constant 0 : i32
    %2 = arith.cmpi ne, %1, %c0_i32_0 : i32
    scf.if %2 {
      %cst_14 = arith.constant 0.000000e+00 : f32
      %27 = vector.broadcast %cst_14 : f32 to vector<16x128xf32>
      %c0_15 = arith.constant 0 : index
      %c0_16 = arith.constant 0 : index
      %28 = vector.load %arg9[%c0_15, %c0_16] : memref<16x128xf32, #tpu.memory_space<vmem>>, vector<16x128xf32>
      tpu.vector_store %arg9[%c0_15, %c0_16], %27 {strides = array<i32>} : memref<16x128xf32, #tpu.memory_space<vmem>>, vector<16x128xf32>,
    } else {
    }
    %c0 = arith.constant 0 : index
    %c0_1 = arith.constant 0 : index
    %3 = vector.load %arg4[%c0, %c0_1] : memref<128x16xbf16, #tpu.memory_space<vmem>>, vector<128x16xbf16>
    %c0_2 = arith.constant 0 : index
    %c0_3 = arith.constant 0 : index
    %4 = vector.load %arg5[%c0_2, %c0_3] : memref<16x128xbf16, #tpu.memory_space<vmem>>, vector<16x128xbf16>
    %cst = arith.constant dense<0.000000e+00> : vector<128x128xf32>
    %5 = tpu.matmul %3, %4, %cst {dimension_numbers = #tpu.dot_dimension_numbers<[1], [0], [0], [1], [0, 0, 1, 1], [], []>} : vector<128x16xbf16>, vector<16x128xbf16>, vector<128x128xf32> -> vector<128x128xf32>
    %c0_4 = arith.constant 0 : index
    %c0_5 = arith.constant 0 : index
    %6 = vector.load %arg3[%c0_4, %c0_5] : memref<128x128xbf16, #tpu.memory_space<vmem>>, vector<128x128xbf16>
    %7 = arith.extf %6 : vector<128x128xbf16> to vector<128x128xf32>
    %8 = arith.mulf %7, %5 : vector<128x128xf32>
    %c16_i32 = arith.constant 16 : i32
    %9 = arith.muli %arg0, %c16_i32 : i32
    %10 = tpu.iota {dimensions = array<i32: 0>} : vector<16x128xi32>
    %11 = vector.broadcast %9 : i32 to vector<16x128xi32>
    %12 = arith.addi %10, %11 : vector<16x128xi32>
    %c0_6 = arith.constant 0 : index
    %c0_7 = arith.constant 0 : index
    %13 = vector.load %arg2[%c0_6, %c0_7] : memref<1x128xi32, #tpu.memory_space<vmem>>, vector<1x128xi32>
    %14 = vector.broadcast %13 : vector<1x128xi32> to vector<16x128xi32>
    %15 = arith.cmpi eq, %12, %14 : vector<16x128xi32>
    %16 = arith.extui %15 : vector<16x128xi1> to vector<16x128xi32>
    %17 = arith.sitofp %16 : vector<16x128xi32> to vector<16x128xf32>
    %18 = arith.truncf %17 : vector<16x128xf32> to vector<16x128xbf16>
    %c0_8 = arith.constant 0 : index
    %c0_9 = arith.constant 0 : index
    %19 = vector.load %arg9[%c0_8, %c0_9] : memref<16x128xf32, #tpu.memory_space<vmem>>, vector<16x128xf32>
    %20 = arith.truncf %8 : vector<128x128xf32> to vector<128x128xbf16>
    %cst_10 = arith.constant dense<0.000000e+00> : vector<16x128xf32>
    %21 = tpu.matmul %18, %20, %cst_10 {dimension_numbers = #tpu.dot_dimension_numbers<[1], [0], [0], [1], [0, 0, 1, 1], [], []>} : vector<16x128xbf16>, vector<128x128xbf16>, vector<16x128xf32> -> vector<16x128xf32>
    %22 = arith.addf %19, %21 : vector<16x128xf32>
    %c0_11 = arith.constant 0 : index
    %c0_12 = arith.constant 0 : index
    %23 = vector.load %arg9[%c0_11, %c0_12] : memref<16x128xf32, #tpu.memory_space<vmem>>, vector<16x128xf32>
    tpu.vector_store %arg9[%c0_11, %c0_12], %22 {strides = array<i32>} : memref<16x128xf32, #tpu.memory_space<vmem>>, vector<16x128xf32>,
    %c2_i32 = arith.constant 2 : i32
    %24 = arith.cmpi eq, %arg1, %c2_i32 : i32
    %25 = arith.extui %24 : i1 to i32
    %c0_i32_13 = arith.constant 0 : i32
    %26 = arith.cmpi ne, %25, %c0_i32_13 : i32
    scf.if %26 {
      %c0_14 = arith.constant 0 : index
      %c0_15 = arith.constant 0 : index
      %27 = vector.load %arg9[%c0_14, %c0_15] : memref<16x128xf32, #tpu.memory_space<vmem>>, vector<16x128xf32>
      %28 = arith.truncf %27 : vector<16x128xf32> to vector<16x128xbf16>
      %c0_16 = arith.constant 0 : index
      %c0_17 = arith.constant 0 : index
      %29 = vector.load %arg6[%c0_16, %c0_17] : memref<128x128xbf16, #tpu.memory_space<vmem>>, vector<128x128xbf16>
      %cst_18 = arith.constant dense<0.000000e+00> : vector<16x128xf32>
      %30 = tpu.matmul %28, %29, %cst_18 {dimension_numbers = #tpu.dot_dimension_numbers<[1], [0], [0], [1], [0, 0, 1, 1], [], []>} : vector<16x128xbf16>, vector<128x128xbf16>, vector<16x128xf32> -> vector<16x128xf32>
      %31 = arith.negf %30 : vector<16x128xf32>
      %32 = math.exp %31 : vector<16x128xf32>
      %cst_19 = arith.constant 1.000000e+00 : f32
      %33 = vector.broadcast %cst_19 : f32 to vector<16x128xf32>
      %34 = arith.addf %33, %32 : vector<16x128xf32>
      %35 = arith.divf %33, %34 : vector<16x128xf32>
      %36 = arith.mulf %30, %35 : vector<16x128xf32>
      %cst_20 = arith.constant 1.66666663 : f32
      %37 = vector.broadcast %cst_20 : f32 to vector<16x128xf32>
      %38 = arith.mulf %36, %37 : vector<16x128xf32>
      %39 = arith.truncf %38 : vector<16x128xf32> to vector<16x128xbf16>
      %c0_21 = arith.constant 0 : index
      %c0_22 = arith.constant 0 : index
      %c0_23 = arith.constant 0 : index
      %40 = vector.load %arg7[%c0_21, %c0_22, %c0_23] : memref<4x128x128xbf16, #tpu.memory_space<vmem>>, vector<1x128x128xbf16>
      %41 = vector.shape_cast %40 : vector<1x128x128xbf16> to vector<128x128xbf16>
      %cst_24 = arith.constant dense<0.000000e+00> : vector<16x128xf32>
      %42 = tpu.matmul %39, %41, %cst_24 {dimension_numbers = #tpu.dot_dimension_numbers<[1], [0], [0], [1], [0, 0, 1, 1], [], []>} : vector<16x128xbf16>, vector<128x128xbf16>, vector<16x128xf32> -> vector<16x128xf32>
      %43 = arith.negf %42 : vector<16x128xf32>
      %44 = math.exp %43 : vector<16x128xf32>
      %cst_25 = arith.constant 1.000000e+00 : f32
      %45 = vector.broadcast %cst_25 : f32 to vector<16x128xf32>
      %46 = arith.addf %45, %44 : vector<16x128xf32>
      %47 = arith.divf %45, %46 : vector<16x128xf32>
      %48 = arith.mulf %42, %47 : vector<16x128xf32>
      %cst_26 = arith.constant 1.66666663 : f32
      %49 = vector.broadcast %cst_26 : f32 to vector<16x128xf32>
      %50 = arith.mulf %48, %49 : vector<16x128xf32>
      %51 = arith.truncf %50 : vector<16x128xf32> to vector<16x128xbf16>
      %c1 = arith.constant 1 : index
      %c0_27 = arith.constant 0 : index
      %c0_28 = arith.constant 0 : index
      %52 = vector.load %arg7[%c1, %c0_27, %c0_28] : memref<4x128x128xbf16, #tpu.memory_space<vmem>>, vector<1x128x128xbf16>
      %53 = vector.shape_cast %52 : vector<1x128x128xbf16> to vector<128x128xbf16>
      %cst_29 = arith.constant dense<0.000000e+00> : vector<16x128xf32>
      %54 = tpu.matmul %51, %53, %cst_29 {dimension_numbers = #tpu.dot_dimension_numbers<[1], [0], [0], [1], [0, 0, 1, 1], [], []>} : vector<16x128xbf16>, vector<128x128xbf16>, vector<16x128xf32> -> vector<16x128xf32>
      %55 = arith.negf %54 : vector<16x128xf32>
      %56 = math.exp %55 : vector<16x128xf32>
      %cst_30 = arith.constant 1.000000e+00 : f32
      %57 = vector.broadcast %cst_30 : f32 to vector<16x128xf32>
      %58 = arith.addf %57, %56 : vector<16x128xf32>
      %59 = arith.divf %57, %58 : vector<16x128xf32>
      %60 = arith.mulf %54, %59 : vector<16x128xf32>
      %cst_31 = arith.constant 1.66666663 : f32
      %61 = vector.broadcast %cst_31 : f32 to vector<16x128xf32>
      %62 = arith.mulf %60, %61 : vector<16x128xf32>
      %63 = arith.addf %38, %62 : vector<16x128xf32>
      %cst_32 = arith.constant 0.707106769 : f32
      %64 = vector.broadcast %cst_32 : f32 to vector<16x128xf32>
      %65 = arith.mulf %63, %64 : vector<16x128xf32>
      %66 = arith.truncf %65 : vector<16x128xf32> to vector<16x128xbf16>
      %c2 = arith.constant 2 : index
      %c0_33 = arith.constant 0 : index
      %c0_34 = arith.constant 0 : index
      %67 = vector.load %arg7[%c2, %c0_33, %c0_34] : memref<4x128x128xbf16, #tpu.memory_space<vmem>>, vector<1x128x128xbf16>
      %68 = vector.shape_cast %67 : vector<1x128x128xbf16> to vector<128x128xbf16>
      %cst_35 = arith.constant dense<0.000000e+00> : vector<16x128xf32>
      %69 = tpu.matmul %66, %68, %cst_35 {dimension_numbers = #tpu.dot_dimension_numbers<[1], [0], [0], [1], [0, 0, 1, 1], [], []>} : vector<16x128xbf16>, vector<128x128xbf16>, vector<16x128xf32> -> vector<16x128xf32>
      %70 = arith.negf %69 : vector<16x128xf32>
      %71 = math.exp %70 : vector<16x128xf32>
      %cst_36 = arith.constant 1.000000e+00 : f32
      %72 = vector.broadcast %cst_36 : f32 to vector<16x128xf32>
      %73 = arith.addf %72, %71 : vector<16x128xf32>
      %74 = arith.divf %72, %73 : vector<16x128xf32>
      %75 = arith.mulf %69, %74 : vector<16x128xf32>
      %cst_37 = arith.constant 1.66666663 : f32
      %76 = vector.broadcast %cst_37 : f32 to vector<16x128xf32>
      %77 = arith.mulf %75, %76 : vector<16x128xf32>
      %78 = arith.truncf %77 : vector<16x128xf32> to vector<16x128xbf16>
      %c3 = arith.constant 3 : index
      %c0_38 = arith.constant 0 : index
      %c0_39 = arith.constant 0 : index
      %79 = vector.load %arg7[%c3, %c0_38, %c0_39] : memref<4x128x128xbf16, #tpu.memory_space<vmem>>, vector<1x128x128xbf16>
      %80 = vector.shape_cast %79 : vector<1x128x128xbf16> to vector<128x128xbf16>
      %cst_40 = arith.constant dense<0.000000e+00> : vector<16x128xf32>
      %81 = tpu.matmul %78, %80, %cst_40 {dimension_numbers = #tpu.dot_dimension_numbers<[1], [0], [0], [1], [0, 0, 1, 1], [], []>} : vector<16x128xbf16>, vector<128x128xbf16>, vector<16x128xf32> -> vector<16x128xf32>
      %82 = arith.negf %81 : vector<16x128xf32>
      %83 = math.exp %82 : vector<16x128xf32>
      %cst_41 = arith.constant 1.000000e+00 : f32
      %84 = vector.broadcast %cst_41 : f32 to vector<16x128xf32>
      %85 = arith.addf %84, %83 : vector<16x128xf32>
      %86 = arith.divf %84, %85 : vector<16x128xf32>
      %87 = arith.mulf %81, %86 : vector<16x128xf32>
      %cst_42 = arith.constant 1.66666663 : f32
      %88 = vector.broadcast %cst_42 : f32 to vector<16x128xf32>
      %89 = arith.mulf %87, %88 : vector<16x128xf32>
      %90 = arith.addf %65, %89 : vector<16x128xf32>
      %cst_43 = arith.constant 0.707106769 : f32
      %91 = vector.broadcast %cst_43 : f32 to vector<16x128xf32>
      %92 = arith.mulf %90, %91 : vector<16x128xf32>
      %c0_44 = arith.constant 0 : index
      %c0_45 = arith.constant 0 : index
      %93 = vector.load %arg8[%c0_44, %c0_45] : memref<16x128xf32, #tpu.memory_space<vmem>>, vector<16x128xf32>
      tpu.vector_store %arg8[%c0_44, %c0_45], %92 {strides = array<i32>} : memref<16x128xf32, #tpu.memory_space<vmem>>, vector<16x128xf32>,
    } else {
    }
    return
  }
  func.func @transform_0(%arg0: i32, %arg1: i32) -> (i32, i32) {
    %c0_i32 = arith.constant 0 : i32
    %c0_i32_0 = arith.constant 0 : i32
    return %c0_i32, %arg1 : i32, i32
  }
  func.func @transform_1(%arg0: i32, %arg1: i32) -> (i32, i32) {
    %c0_i32 = arith.constant 0 : i32
    %c0_i32_0 = arith.constant 0 : i32
    return %arg1, %c0_i32 : i32, i32
  }
  func.func @transform_2(%arg0: i32, %arg1: i32) -> (i32, i32) {
    %c0_i32 = arith.constant 0 : i32
    %c0_i32_0 = arith.constant 0 : i32
    return %arg1, %c0_i32 : i32, i32
  }
  func.func @transform_3(%arg0: i32, %arg1: i32) -> (i32, i32) {
    %c0_i32 = arith.constant 0 : i32
    %c0_i32_0 = arith.constant 0 : i32
    %c0_i32_1 = arith.constant 0 : i32
    return %c0_i32, %c0_i32_0 : i32, i32
  }
  func.func @transform_4(%arg0: i32, %arg1: i32) -> (i32, i32) {
    %c0_i32 = arith.constant 0 : i32
    %c0_i32_0 = arith.constant 0 : i32
    %c0_i32_1 = arith.constant 0 : i32
    return %c0_i32, %c0_i32_0 : i32, i32
  }
  func.func @transform_5(%arg0: i32, %arg1: i32) -> (i32, i32, i32) {
    %c0_i32 = arith.constant 0 : i32
    %c0_i32_0 = arith.constant 0 : i32
    %c0_i32_1 = arith.constant 0 : i32
    %c0_i32_2 = arith.constant 0 : i32
    return %c0_i32, %c0_i32_0, %c0_i32_1 : i32, i32, i32
  }
  func.func @transform_6(%arg0: i32, %arg1: i32) -> (i32, i32) {
    %c0_i32 = arith.constant 0 : i32
    %c0_i32_0 = arith.constant 0 : i32
    return %arg0, %c0_i32 : i32, i32
  }
}

</mosaic_0001>

<bundles_post_ra>
// kernel: tpu_custom_call.1
= control target key start
LH: loop header
LB: loop body
LE: loop exit
PB: predicated region body
PF: predicated region fallthrough
CT: control target
= control target key end

     0   :  { %11 = vsyncpa [#allocation4], 0  ;;  %s2465_s0 = inlined_call_operand.vmem [shape: s32[1,384], index: 0, kind: input, shape index: {}]   ;;  %s2466_s1 = inlined_call_operand.vmem [shape: bf16[384,128], index: 1, kind: input, shape index: {}]   ;;  %s2467_s2 = inlined_call_operand.vmem [shape: bf16[384,16], index: 2, kind: input, shape index: {}]   ;;  %s2468_s3 = inlined_call_operand.vmem [shape: bf16[16,128], index: 3, kind: input, shape index: {}]   ;;  %s2469_s4 = inlined_call_operand.hbm [shape: bf16[128,128], index: 4, kind: input, shape index: {}]   ;;  %s2470_s5 = inlined_call_operand.hbm [shape: bf16[4,128,128], index: 5, kind: input, shape index: {}]   ;;  %s2471_s6 = inlined_call_operand.hbm [shape: f32[48,128], index: 6, kind: output, shape index: {}]  }
   0x1   :  { %12 = vsyncpa [#allocation7], 0 }
   0x2   :  { %13 = vsyncpa [#allocation5], 0 }
   0x3   :  { %15 = vsyncpa [#allocation5 + $0x1], 0  ;;  %s2139_s21 = smov 0   ;;  %s2141_s22 = smov 0  }
   0x4   :  { %s2143_s23 = smov 0   ;;  %s2145_s24 = smov 0  }
   0x5   :  { %s2147_s25 = smov 0   ;;  %s2149_s26 = smov 0  }
   0x6   :  { %s2151_s27 = smov 0   ;;  %s2153_s28 = smov 0  }
   0x7 LB: > { %2480 = sst [smem:[#allocation12_spill]] %s2069_s23  ;;  %s1405_s29 = sadd.s32 4294967295, %s2089_s28   ;;  %s2089_s28 = sphi %s2153_s28, %s21_s28   ;;  %s2085_s27 = sphi %s2151_s27, %s2500_s27   ;;  %s2081_s26 = sphi %s2149_s26, %s2499_s26   ;;  %s2077_s25 = sphi %s2147_s25, %s2498_s25   ;;  %s2073_s24 = sphi %s2145_s24, %s2497_s24   ;;  %s2069_s23 = sphi %s2143_s23, %s2496_s23   ;;  %s2065_s22 = sphi %s2141_s22, %s2502_s22   ;;  %s2061_s21 = sphi %s2139_s21, %s2501_s21  }
   0x8   : > { %2481 = sst [smem:[#allocation13_spill]] %s2081_s26  ;;  %s1406_s30 = sadd.s32 4294967294, %s2089_s28  }
   0x9   : > { %2482 = sst [smem:[#allocation14_spill]] %s2085_s27  ;;  %s30_s7 = sadd.s32 1, %s2081_s26 }
   0xa   : > { %s33_s8 = sadd.s32 1, %s2085_s27  ;;  %p31_p0 = scmp.ge.s32.totalorder %s30_s7, 3 }
   0xb   : > { %s181_s9 = sadd.s32 1, %s2069_s23  ;;  %p191_p1 = scmp.ne.s32.totalorder %s2069_s23, %s2065_s22 }
   0xc   : > { %p192_p2 = scmp.eq.s32.totalorder %s1405_s29, 8  ;;  %s2504_s7 = smov (%p31_p0, %s30_s7), 0 }
   0xd   : > { %2483 = sst [smem:[#allocation15_spill]] %s2504_s7  ;;  %s2506_s8 = smov (!%p31_p0, %s33_s8), %s2085_s27 }
   0xe   : > { %p2189_p3 = por %p192_p2, %p191_p1  ;;  %p197_p4 = scmp.ne.s32.totalorder %s2065_s22, %s2061_s21 }
   0xf   : > { %p35_p5 = scmp.ge.s32.totalorder %s2506_s8, 3  ;;  %p198_p6 = scmp.eq.s32.totalorder %s1406_s30, 8 }
  0x10   : > { %s2484_s10 = scalar_select %p2189_p3, 1, 0 }
  0x11   : > { %p1407_p7 = scmp.ge.s32.totalorder %s2089_s28, 1  ;;  %p205_p8 = scmp.lt.s32.totalorder %s2089_s28, 10 }
  0x12   : > { %s2508_s8 = smov (%p35_p5, %s2506_s8), 0  ;;  %p2199_p9 = por %p198_p6, %p197_p4 }
  0x13   : > { %2485 = sst [smem:[#allocation16_spill]] %s2508_s8  ;;  %p2203_p10 = pnand %p1407_p7, %p205_p8 }
  0x14   : > { %s2486_s11 = scalar_select %p2199_p9, 1, 0 }
  0x15   : > { %s2487_s12 = scalar_select %p2203_p10, 1, 0 }
  0x16   : > { %s178_s13 = ssub.s32 %s2085_s27, %s2508_s8  ;;  %p1750_p12 = pneg %p2203_p10 }
  0x17   : > { %p179_p11 = scmp.eq.s32.totalorder %s178_s13, 0  ;;  %p2211_p13 = scmp.eq.s32.totalorder %s1405_s29, 0 }
  0x18   : > { %s2091_s16 = smov [#allocation3]   ;;  %s1931_s29 = scalar_lea.hbm %s2469_s4, 1024 }
  0x19   : > { %s2488_s14 = scalar_select %p2211_p13, 1, 0 }
  0x1a   : > { %s2216_s15 = scalar_select %p179_p11, %s2069_s23, %s181_s9  }
  0x1b   : > { %s220_s17 = sshll.u32 %s2091_s16, 4  ;;  %p2220_p0 = pnand %p2211_p13, %p1750_p12  ;;  %s221_s17 = int_to_ptr.vmem [resolvable:$true] %s220_s17 }
  0x1c   : > { %2489 = sst [smem:[#allocation17_spill]] %s2216_s15  ;;  %p1932_p1 = scmp.ne.s32.totalorder %s2469_s4, %s1931_s29 }
  0x1d   : > { %p1933_p2 = pneg %p2220_p0  ;;  %p1938_p6 = scmp.lt.u32.totalorder %s1931_s29, %s2469_s4 }
  0x1f   : > { %p1934_p4 = pnand %p1933_p2, %p1932_p1 }
  0x21   : > { %p1935_p5 = pneg %p1934_p4 }
  0x23   : > { %p1940_p7 = pnand %p1938_p6, %p1935_p5 }
  0x25   : > { %1943 = shalt.err (!%p1940_p7)
}
  0x26   : > { %s1944_s8 = scalar_lea.vmem %s221_s17, 1024  ;;  %p1952_p9 = scmp.lt.s32.totalorder %s221_s17, %s221_s17 }
  0x27   : > { %p1945_p8 = scmp.ne.s32.totalorder %s221_s17, %s1944_s8  ;;  %p1953_p3 = scmp.lt.s32.totalorder %s1944_s8, %s1944_s8 }
  0x29   : > { %p1947_p11 = pnand %p1945_p8, %p1933_p2  ;;  %p1954_p13 = por %p1953_p3, %p1952_p9 }
  0x2b   : > { %p1948_p12 = pneg %p1947_p11 }
  0x2d   : > { %p1955_p10 = pnand %p1954_p13, %p1948_p12 }
  0x2f   : > { %1958 = shalt.err (!%p1955_p10)
}
  0x30   : > { %s2092_s19 = smov 64   ;;  %s2093_s20 = smov 4  }
  0x31   : > { %1753 = dma.hbm_to_vmem [thread:$0]  (!%p2220_p0), %s2469_s4, 1024, %s221_s17, [#allocation4], %s2092_s19, %s2092_s19, %s2093_s20  }
  0x32   : > { %s2094_s13 = smov [#allocation6]   ;;  %s1959_s27 = scalar_lea.hbm %s2470_s5, 4096 }
  0x33   : > { %s233_s9 = sshll.u32 %s2094_s13, 4  ;;  %p1960_p3 = scmp.ne.s32.totalorder %s2470_s5, %s1959_s27  ;;  %s234_s9 = int_to_ptr.vmem [resolvable:$true] %s233_s9 }
  0x34   : > { %p1966_p13 = scmp.lt.u32.totalorder %s1959_s27, %s2470_s5 }
  0x35   : > { %p1962_p9 = pnand %p1960_p3, %p1933_p2 }
  0x37   : > { %p1963_p10 = pneg %p1962_p9 }
  0x39   : > { %p1968_p1 = pnand %p1966_p13, %p1963_p10 }
  0x3b   : > { %1971 = shalt.err (!%p1968_p1)
}
  0x3c   : > { %s1972_s17 = scalar_lea.vmem %s234_s9, 4096  ;;  %p1980_p7 = scmp.lt.s32.totalorder %s234_s9, %s234_s9 }
  0x3d   : > { %p1973_p4 = scmp.ne.s32.totalorder %s234_s9, %s1972_s17  ;;  %p1981_p8 = scmp.lt.s32.totalorder %s1972_s17, %s1972_s17 }
  0x3f   : > { %p1975_p5 = pnand %p1973_p4, %p1933_p2  ;;  %p1982_p11 = por %p1981_p8, %p1980_p7 }
  0x41   : > { %p1976_p6 = pneg %p1975_p5 }
  0x43   : > { %p1983_p12 = pnand %p1982_p11, %p1976_p6 }
  0x45   : > { %1986 = shalt.err (!%p1983_p12)
}
  0x46   : > { %1756 = dma.hbm_to_vmem [thread:$0]  (!%p2220_p0), %s2470_s5, 4096, %s234_s9, [#allocation7], %s2092_s19, %s2092_s19, %s2093_s20  }
  0x47   : > { %p2491_p3 = scmp.ne.s32.totalorder %s2487_s12, 0 }
  0x48   : > { %p2492_p9 = scmp.ne.s32.totalorder (!%p2491_p3), %s2488_s14, 0 }
  0x49   : > { %273 = sbr.rel (%p2491_p3) target bundleno = 1841 (0x731), region = 44 }
  0x50   : > { %2048 = dma.done.wait (%p2492_p9), [#allocation4], 1024  }
  0x51   : > { %2050 = vsyncadd (%p2492_p9), [#allocation4], 4294966272 }
  0x52   : > { %2052 = dma.done.wait (%p2492_p9), [#allocation7], 4096  }
  0x53   : > { %2054 = vsyncadd (%p2492_p9), [#allocation7], 4294963200  ;;  %s312_s23 = sand.u32 1, %s2065_s22   ;;  %p315_p0 = scmp.lt.s32.totalorder %s2073_s24, 2 }
  0x54   : > { %s1414_s27 = sshll.u32 %s312_s23, 4  ;;  %s1415_s12 = sshll.u32 %s2073_s24, 4 }
  0x55   : > { %p319_p2 = scmp.lt.s32.totalorder %s1415_s12, 47  ;;  %s2296_s17 = scalar_lea.vmem [#allocation8], %s1414_s27 }
  0x56   : > { %s2282_s15 = scalar_select %p315_p0, %s2073_s24, 2 }
  0x57   : > { %s2510_s12 = smov (!%p319_p2, %s1415_s12), 47  ;;  %p1419_p10 = scmp.ne.s32.totalorder %s2073_s24, 0 }
  0x58   : > { %s317_s14 = scalar_lea.vmem %s2465_s0, %s2282_s15  ;;  %s1416_s20 = sshll.u32 %s2510_s12, 2  ;;  %v2095_v0 = vmov (!%p1419_p10), 0.0  }
  0x59   : > { %s2291_s13 = scalar_lea.vmem %s2466_s1, %s1416_s20  ;;  %s328_s8 = scalar_lea.vmem %s2467_s2, %s1416_s20  ;;  %336 = vst [vmem:[#allocation2] sm:$0xff] (!%p1419_p10), %v2095_v0  ;;  %337 = vst [vmem:[#allocation2 + $0x8] sm:$0xff] (!%p1419_p10), %v2095_v0 }
  0x5a   : > { %335 = sbr.rel (%p1419_p10) target bundleno = 97 (0x61), region = 56 }
  0x61 PF: > { %v1842_v1 = vld [vmem:[%s2468_s3] sm:$0xff]   ;;  %vm402_vm0 = vcmask 130048   ;;  %v1844_v3 = vld [vmem:[%s328_s8 + $0x8] sm:$0xff]   ;;  %v1845_v4 = vld [vmem:[%s328_s8 + $0x10] sm:$0xff]   ;;  %v2096_v10 = vmov 0.0   ;;  %vm2097_vm1 = vmmov 0   ;;  %v573_v51 = vlaneseq }
  0x62   : > { %v1843_v2 = vld [vmem:[%s328_s8] sm:$0xff]   ;;  %1602 = vmatprep.subr.bf16.mxu0 %v1842_v1  ;;  %v1846_v5 = vld [vmem:[%s328_s8 + $0x18] sm:$0xff]   ;;  %v1848_v7 = vld [vmem:[%s328_s8 + $0x28] sm:$0xff]   ;;  %1620 = vmatprep.subr.bf16.mxu1 %v2096_v10  ;;  %s1437_s27 = sshll.u32 %s2077_s25, 4  ;;  %p1443_p13 = scmp.ne.s32.totalorder %s2073_s24, 2 }
  0x63   : > { %1603 = vmatpush3.bf16.msra.mxu0 %v1842_v1  ;;  %1604 = vmatprep.mubr.msk.bf16.mxu0 %vm402_vm0, %v1843_v2  ;;  %v1847_v6 = vld [vmem:[%s328_s8 + $0x20] sm:$0xff]   ;;  %v1849_v8 = vld [vmem:[%s328_s8 + $0x30] sm:$0xff]   ;;  %v1850_v9 = vld [vmem:[%s328_s8 + $0x38] sm:$0xff]   ;;  %v574_v61 = vshrl.u32 %v573_v51, 7  ;;  %vm2100_vm5 = vmmov (!%p1443_p13), 0  }
  0x64   : > { %1636 = vmatprep.mubr.msk.bf16.mxu1 %vm2097_vm1, %v2096_v10  ;;  %v1532_v11 = vld [vmem:[%s2291_s13 + $0x8] sm:$0xff]   ;;  %v1501_v12 = vld [vmem:[%s2291_s13] sm:$0xff]   ;;  %v1534_v25 = vld [vmem:[%s2291_s13 + $0x18] sm:$0xff]  }
  0x65   : > { %v1506_v13 = vunpack.c.l.bf16 %v1532_v11  ;;  %v1507_v14 = vunpack.c.h.bf16 %v1532_v11  ;;  %v1502_v16 = vunpack.c.l.bf16 %v1501_v12  ;;  %v1503_v17 = vunpack.c.h.bf16 %v1501_v12  ;;  %v1533_v27 = vld [vmem:[%s2291_s13 + $0x10] sm:$0xff]   ;;  %v1536_v41 = vld [vmem:[%s2291_s13 + $0x28] sm:$0xff]   ;;  %v1535_v43 = vld [vmem:[%s2291_s13 + $0x20] sm:$0xff]  }
  0x66   : > { %1605 = vmatmul.mubr.msk.bf16.vlgmr.msra.gmra.mrb[0].mxu0 %vm402_vm0, %v1844_v3  ;;  %v1514_v29 = vunpack.c.l.bf16 %v1534_v25  ;;  %v1515_v30 = vunpack.c.h.bf16 %v1534_v25  ;;  %v1510_v32 = vunpack.c.l.bf16 %v1533_v27  ;;  %v1511_v33 = vunpack.c.h.bf16 %v1533_v27  ;;  %v1538_v58 = vld [vmem:[%s2291_s13 + $0x38] sm:$0xff]   ;;  %v1537_v60 = vld [vmem:[%s2291_s13 + $0x30] sm:$0xff]  }
  0x67   : > { %1608 = vmatprep.mubr.msk.bf16.mxu0 %vm402_vm0, %v1845_v4  ;;  %v1522_v45 = vunpack.c.l.bf16 %v1536_v41  ;;  %v1523_v46 = vunpack.c.h.bf16 %v1536_v41  ;;  %v1518_v48 = vunpack.c.l.bf16 %v1535_v43  ;;  %v1519_v49 = vunpack.c.h.bf16 %v1535_v43  ;;  %v1861_v41 = vld [vmem:[#allocation6 + $0x10] sm:$0xff] (!%p1443_p13)   ;;  %v1863_v43 = vld [vmem:[#allocation6 + $0x20] sm:$0xff] (!%p1443_p13)  }
  0x68   : > { %v1530_v63 = vunpack.c.l.bf16 %v1538_v58  ;;  %v1531_v0 = vunpack.c.h.bf16 %v1538_v58  ;;  %v1526_v2 = vunpack.c.l.bf16 %v1537_v60  ;;  %v1527_v3 = vunpack.c.h.bf16 %v1537_v60 }
  0x6e   : > { %1609 = vmatmul.mubr.msk.bf16.gmra.mrb[4].mxu0 %vm402_vm0, %v1846_v5  ;;  %v575_v5 = vadd.s32 8, %v574_v61 }
  0x6f   : > { %1612 = vmatprep.mubr.msk.bf16.mxu0 %vm402_vm0, %v1847_v6 }
  0x76   : > { %1613 = vmatmul.mubr.msk.bf16.gmra.mrb[8].mxu0 %vm402_vm0, %v1848_v7  ;;  %v576_v7 = vstv %s1437_s27 }
  0x77   : > { %1616 = vmatprep.mubr.msk.bf16.mxu0 %vm402_vm0, %v1849_v8 }
  0x7e   : > { %1617 = vmatmul.mubr.msk.bf16.gmra.mrb[12].mxu0 %vm402_vm0, %v1850_v9 }
 0x139   : > { %v1606_v15 = vpop.f32.mrb[0].mxu0 }
 0x13a   : > { %v461_v18 = vpop.f32.mrb[1].mxu0  ;;  %v558_v20 = vmul.f32 %v1606_v15, %v1506_v13  ;;  %v577_v15 = vadd.s32 %v576_v7, %v574_v61 }
 0x13b   : > { %v1607_v19 = vpop.f32.mrb[2].mxu0  ;;  %v556_v23 = vmul.f32 %v1502_v16, %v461_v18  ;;  %v578_v16 = vadd.s32 %v576_v7, %v575_v5  ;;  %v1438_v18 = vld [vmem:[%s317_s14] ss:$0 sm:$0xff]  ;;  %v1872_v5 = vld [vmem:[#allocation6 + $0x68] sm:$0xff] (!%p1443_p13)   ;;  %v1874_v7 = vld [vmem:[#allocation6 + $0x78] sm:$0xff] (!%p1443_p13)  }
 0x13c   : > { %v559_v21 = vmul.f32 %v1607_v19, %v1507_v14  ;;  %v464_v22 = vpop.f32.mrb[3].mxu0  ;;  %vm584_vm2 = vcmp.eq.s32.totalorder %v577_v15, %v1438_v18  ;;  %v2098_v19 = vmov 1.0|1.0  }
 0x13d   : > { %v557_v24 = vmul.f32 %v1503_v17, %v464_v22  ;;  %vm585_vm3 = vcmp.eq.s32.totalorder %v578_v16, %v1438_v18  ;;  %v592_v22 = vld [vmem:[#allocation2 + $0x8] sm:$0xff] }
 0x13e   : > { %v594_v26 = vpack.c.bf16 %v559_v21, %v558_v20  ;;  %vm1441_vm4 = vmpackc.low %vm585_vm3, %vm584_vm2  ;;  %v591_v20 = vld [vmem:[#allocation2] sm:$0xff] }
 0x13f   : > { %v593_v28 = vpack.c.bf16 %v557_v24, %v556_v23 }
 0x141   : > { %v1610_v31 = vpop.f32.mrb[4].mxu0  ;;  %1621 = vmatpush3.bf16.msra.mxu1 %v593_v28  ;;  %v2099_v28 = vmov (!%p1443_p13), 0.0  }
 0x142   : > { %v477_v34 = vpop.f32.mrb[5].mxu0  ;;  %1622 = vmatprep.subr.bf16.mxu1 %v2096_v10  ;;  %v562_v36 = vmul.f32 %v1610_v31, %v1514_v29  ;;  %1640 = vmatprep.subr.bf16.mxu0 (!%p1443_p13), %v2099_v28  ;;  %v1852_v29 = vld [vmem:[#allocation3 + $0x8] sm:$0xff] (!%p1443_p13)   ;;  %v1854_v31 = vld [vmem:[#allocation3 + $0x18] sm:$0xff] (!%p1443_p13)  }
 0x143   : > { %v1611_v35 = vpop.f32.mrb[6].mxu0  ;;  %v560_v39 = vmul.f32 %v1510_v32, %v477_v34  ;;  %1656 = vmatprep.mubr.msk.bf16.mxu0 (!%p1443_p13), %vm2100_vm5, %v2099_v28  ;;  %v1855_v32 = vld [vmem:[#allocation3 + $0x20] sm:$0xff] (!%p1443_p13)   ;;  %v1857_v34 = vld [vmem:[#allocation3 + $0x30] sm:$0xff] (!%p1443_p13)  }
 0x144   : > { %v563_v37 = vmul.f32 %v1611_v35, %v1515_v30  ;;  %v480_v38 = vpop.f32.mrb[7].mxu0  ;;  %v1853_v30 = vld [vmem:[#allocation3 + $0x10] sm:$0xff] (!%p1443_p13)   ;;  %v1858_v35 = vld [vmem:[#allocation3 + $0x38] sm:$0xff] (!%p1443_p13)  }
 0x145   : > { %v561_v40 = vmul.f32 %v1511_v33, %v480_v38  ;;  %1623 = vmatpush3.bf16.msra.mxu1 %v594_v26  ;;  %v1856_v33 = vld [vmem:[#allocation3 + $0x28] sm:$0xff] (!%p1443_p13)  }
 0x146   : > { %v596_v42 = vpack.c.bf16 %v563_v37, %v562_v36  ;;  %1624 = vmatprep.subr.bf16.mxu1 %v2096_v10 }
 0x147   : > { %v595_v44 = vpack.c.bf16 %v561_v40, %v560_v39  ;;  %v1859_v39 = vld [vmem:[#allocation6] sm:$0xff] (!%p1443_p13)   ;;  %v1860_v40 = vld [vmem:[#allocation6 + $0x8] sm:$0xff] (!%p1443_p13)  }
 0x149   : > { %v1614_v47 = vpop.f32.mrb[8].mxu0  ;;  %1625 = vmatpush3.bf16.msra.mxu1 %v595_v44  ;;  %v1864_v44 = vld [vmem:[#allocation6 + $0x28] sm:$0xff] (!%p1443_p13)  }
 0x14a   : > { %v493_v50 = vpop.f32.mrb[9].mxu0  ;;  %1626 = vmatprep.subr.bf16.mxu1 %v2096_v10  ;;  %v566_v53 = vmul.f32 %v1614_v47, %v1522_v45  ;;  %v1865_v45 = vld [vmem:[#allocation6 + $0x30] sm:$0xff] (!%p1443_p13)  }
 0x14b   : > { %v1615_v52 = vpop.f32.mrb[10].mxu0  ;;  %v564_v56 = vmul.f32 %v1518_v48, %v493_v50 }
 0x14c   : > { %v567_v54 = vmul.f32 %v1615_v52, %v1523_v46  ;;  %v496_v55 = vpop.f32.mrb[11].mxu0  ;;  %v1866_v46 = vld [vmem:[#allocation6 + $0x38] sm:$0xff] (!%p1443_p13)  }
 0x14d   : > { %v565_v57 = vmul.f32 %v1519_v49, %v496_v55  ;;  %1627 = vmatpush3.bf16.msra.mxu1 %v596_v42  ;;  %v1862_v42 = vld [vmem:[#allocation6 + $0x18] sm:$0xff] (!%p1443_p13)  }
 0x14e   : > { %v598_v59 = vpack.c.bf16 %v567_v54, %v566_v53  ;;  %1628 = vmatprep.subr.bf16.mxu1 %v2096_v10 }
 0x14f   : > { %v597_v62 = vpack.c.bf16 %v565_v57, %v564_v56 }
 0x151   : > { %v1618_v1 = vpop.f32.mrb[12].mxu0  ;;  %1629 = vmatpush3.bf16.msra.mxu1 %v597_v62 }
 0x152   : > { %v509_v4 = vpop.f32.mrb[13].mxu0  ;;  %1630 = vmatprep.subr.bf16.mxu1 %v2096_v10  ;;  %v570_v8 = vmul.f32 %v1618_v1, %v1530_v63  ;;  %v1868_v1 = vld [vmem:[#allocation6 + $0x48] sm:$0xff] (!%p1443_p13)  }
 0x153   : > { %v1619_v6 = vpop.f32.mrb[14].mxu0  ;;  %v568_v12 = vmul.f32 %v1526_v2, %v509_v4  ;;  %v1869_v2 = vld [vmem:[#allocation6 + $0x50] sm:$0xff] (!%p1443_p13)   ;;  %v1871_v4 = vld [vmem:[#allocation6 + $0x60] sm:$0xff] (!%p1443_p13)  }
 0x154   : > { %v571_v9 = vmul.f32 %v1619_v6, %v1531_v0  ;;  %v512_v11 = vpop.f32.mrb[15].mxu0  ;;  %v1867_v0 = vld [vmem:[#allocation6 + $0x40] sm:$0xff] (!%p1443_p13)   ;;  %v1873_v6 = vld [vmem:[#allocation6 + $0x70] sm:$0xff] (!%p1443_p13)  }
 0x155   : > { %v569_v13 = vmul.f32 %v1527_v3, %v512_v11  ;;  %1631 = vmatpush3.bf16.msra.mxu1 %v598_v59  ;;  %v1870_v3 = vld [vmem:[#allocation6 + $0x58] sm:$0xff] (!%p1443_p13)  }
 0x156   : > { %v600_v14 = vpack.c.bf16 %v571_v9, %v570_v8  ;;  %1632 = vmatprep.subr.bf16.mxu1 %v2096_v10 }
 0x157   : > { %v599_v17 = vpack.c.bf16 %v569_v13, %v568_v12 }
 0x159   : > { %1633 = vmatpush3.bf16.msra.mxu1 %v599_v17 }
 0x15a   : > { %1634 = vmatprep.subr.bf16.mxu1 %v2096_v10  ;;  %v1851_v10 = vld [vmem:[#allocation3] sm:$0xff] (!%p1443_p13)  }
 0x15b   : > { %1641 = vmatpush3.bf16.msra.mxu0 (!%p1443_p13), %v1851_v10  ;;  %v1877_v10 = vld [vmem:[#allocation6 + $0x90] sm:$0xff] (!%p1443_p13)  }
 0x15c   : > { %1642 = vmatprep.subr.bf16.mxu0 (!%p1443_p13), %v2099_v28 }
 0x15d   : > { %1635 = vmatpush3.bf16.msra.mxu1 %v600_v14 }
 0x15e   : > { %1660 = vmatprep.subr.bf16.mxu1 (!%p1443_p13), %v2099_v28 }
 0x15f   : > { %1643 = vmatpush3.bf16.msra.mxu0 (!%p1443_p13), %v1852_v29  ;;  %v1878_v29 = vld [vmem:[#allocation6 + $0x98] sm:$0xff] (!%p1443_p13)  }
 0x160   : > { %1637 = vmatmul.mubr.msk.bf16.vlgmr.msra.gmra.mrb[0].mxu1 %vm1441_vm4, %v2098_v19  ;;  %1644 = vmatprep.subr.bf16.mxu0 (!%p1443_p13), %v2099_v28 }
 0x161   : > { %1676 = vmatprep.mubr.msk.bf16.mxu1 (!%p1443_p13), %vm2100_vm5, %v2099_v28  ;;  %1661 = vmatpush3.bf16.msra.mxu1 (!%p1443_p13), %v1859_v39 }
 0x162   : > { %1662 = vmatprep.subr.bf16.mxu1 (!%p1443_p13), %v2099_v28 }
 0x163   : > { %1645 = vmatpush3.bf16.msra.mxu0 (!%p1443_p13), %v1853_v30  ;;  %v1879_v30 = vld [vmem:[#allocation6 + $0xa0] sm:$0xff] (!%p1443_p13)  }
 0x164   : > { %1646 = vmatprep.subr.bf16.mxu0 (!%p1443_p13), %v2099_v28 }
 0x165   : > { %1663 = vmatpush3.bf16.msra.mxu1 (!%p1443_p13), %v1860_v40 }
 0x166   : > { %1664 = vmatprep.subr.bf16.mxu1 (!%p1443_p13), %v2099_v28 }
 0x167   : > { %1647 = vmatpush3.bf16.msra.mxu0 (!%p1443_p13), %v1854_v31  ;;  %v1880_v31 = vld [vmem:[#allocation6 + $0xa8] sm:$0xff] (!%p1443_p13)  }
 0x168   : > { %1648 = vmatprep.subr.bf16.mxu0 (!%p1443_p13), %v2099_v28 }
 0x169   : > { %1665 = vmatpush3.bf16.msra.mxu1 (!%p1443_p13), %v1861_v41 }
 0x16a   : > { %1666 = vmatprep.subr.bf16.mxu1 (!%p1443_p13), %v2099_v28 }
 0x16b   : > { %1649 = vmatpush3.bf16.msra.mxu0 (!%p1443_p13), %v1855_v32  ;;  %v1881_v32 = vld [vmem:[#allocation6 + $0xb0] sm:$0xff] (!%p1443_p13)  }
 0x16c   : > { %1650 = vmatprep.subr.bf16.mxu0 (!%p1443_p13), %v2099_v28 }
 0x16d   : > { %1667 = vmatpush3.bf16.msra.mxu1 (!%p1443_p13), %v1862_v42 }
 0x16e   : > { %1668 = vmatprep.subr.bf16.mxu1 (!%p1443_p13), %v2099_v28 }
 0x16f   : > { %1651 = vmatpush3.bf16.msra.mxu0 (!%p1443_p13), %v1856_v33  ;;  %v1882_v33 = vld [vmem:[#allocation6 + $0xb8] sm:$0xff] (!%p1443_p13)  }
 0x170   : > { %1652 = vmatprep.subr.bf16.mxu0 (!%p1443_p13), %v2099_v28 }
 0x171   : > { %1669 = vmatpush3.bf16.msra.mxu1 (!%p1443_p13), %v1863_v43 }
 0x172   : > { %1670 = vmatprep.subr.bf16.mxu1 (!%p1443_p13), %v2099_v28 }
 0x173   : > { %1653 = vmatpush3.bf16.msra.mxu0 (!%p1443_p13), %v1857_v34 }
 0x174   : > { %1654 = vmatprep.subr.bf16.mxu0 (!%p1443_p13), %v2099_v28 }
 0x175   : > { %1671 = vmatpush3.bf16.msra.mxu1 (!%p1443_p13), %v1864_v44 }
 0x176   : > { %1672 = vmatprep.subr.bf16.mxu1 (!%p1443_p13), %v2099_v28 }
 0x177   : > { %1655 = vmatpush3.bf16.msra.mxu0 (!%p1443_p13), %v1858_v35 }
 0x178   : > { %1680 = vmatprep.subr.bf16.mxu0 (!%p1443_p13), %v2099_v28 }
 0x179   : > { %1673 = vmatpush3.bf16.msra.mxu1 (!%p1443_p13), %v1865_v45 }
 0x17a   : > { %1674 = vmatprep.subr.bf16.mxu1 (!%p1443_p13), %v2099_v28 }
 0x17d   : > { %1675 = vmatpush3.bf16.msra.mxu1 (!%p1443_p13), %v1866_v46 }
 0x17e   : > { %1700 = vmatprep.subr.bf16.mxu1 (!%p1443_p13), %v2099_v28 }
 0x232   : > { %649 = sbr.rel (%p1443_p13) target bundleno = 1815 (0x717), region = 60 }
 0x233   : > { %v635_v21 = vpop.f32.mrb[0].mxu1 }
 0x234   : > { %v642_v23 = vadd.f32 %v635_v21, %v591_v20  ;;  %v1638_v24 = vpop.f32.mrb[1].mxu1 }
 0x235   : > { %v638_v25 = vpop.f32.mrb[2].mxu1 }
 0x236   : > { %644 = vst [vmem:[#allocation2] sm:$0xff] %v642_v23  ;;  %v643_v26 = vadd.f32 %v638_v25, %v592_v22  ;;  %v1639_v27 = vpop.f32.mrb[3].mxu1 }
 0x237   : > { %v1876_v27 = vld [vmem:[#allocation6 + $0x88] sm:$0xff] (!%p1443_p13)  }
 0x238   : > { %645 = vst [vmem:[#allocation2 + $0x8] sm:$0xff] %v643_v26  ;;  %v1875_v26 = vld [vmem:[#allocation6 + $0x80] sm:$0xff] (!%p1443_p13)  }
 0x23d   : > { %v650_v36 = vld [vmem:[#allocation2] sm:$0xff] }
 0x23f   : > { %v651_v37 = vld [vmem:[#allocation2 + $0x8] sm:$0xff] }
 0x240   : > { %v652_v38 = vpack.c.bf16 %v651_v37, %v650_v36 }
 0x242   : > { %1657 = vmatmul.mubr.bf16.vlgmr.msra.gmra.mrb[0].mxu0 %v652_v38 }
 0x243   : > { %1696 = vmatprep.mubr.msk.bf16.mxu0 %vm2100_vm5, %v2099_v28  ;;  %1681 = vmatpush3.bf16.msra.mxu0 %v1867_v0 }
 0x244   : > { %1682 = vmatprep.subr.bf16.mxu0 %v2099_v28 }
 0x247   : > { %1683 = vmatpush3.bf16.msra.mxu0 %v1868_v1 }
 0x248   : > { %1684 = vmatprep.subr.bf16.mxu0 %v2099_v28 }
 0x24b   : > { %1685 = vmatpush3.bf16.msra.mxu0 %v1869_v2 }
 0x24c   : > { %1686 = vmatprep.subr.bf16.mxu0 %v2099_v28 }
 0x24f   : > { %1687 = vmatpush3.bf16.msra.mxu0 %v1870_v3 }
 0x250   : > { %1688 = vmatprep.subr.bf16.mxu0 %v2099_v28 }
 0x253   : > { %1689 = vmatpush3.bf16.msra.mxu0 %v1871_v4 }
 0x254   : > { %1690 = vmatprep.subr.bf16.mxu0 %v2099_v28 }
 0x257   : > { %1691 = vmatpush3.bf16.msra.mxu0 %v1872_v5 }
 0x258   : > { %1692 = vmatprep.subr.bf16.mxu0 %v2099_v28 }
 0x25b   : > { %1693 = vmatpush3.bf16.msra.mxu0 %v1873_v6 }
 0x25c   : > { %1694 = vmatprep.subr.bf16.mxu0 %v2099_v28 }
 0x25f   : > { %1695 = vmatpush3.bf16.msra.mxu0 %v1874_v7 }
 0x260   : > { %1720 = vmatprep.subr.bf16.mxu0 %v2099_v28 }
 0x315   : > { %v751_v47 = vpop.f32.mrb[0].mxu0 }
 0x316   : > { %v1452_v48 = vmul.f32 -1.442695, %v751_v47  ;;  %v1658_v49 = vpop.f32.mrb[1].mxu0 }
 0x317   : > { %v754_v50 = vpop.f32.mrb[2].mxu0 }
 0x318   : > { %1891 = vpow2.f32 %v1452_v48  ;;  %v1453_v51 = vmul.f32 -1.442695, %v754_v50  ;;  %v1659_v52 = vpop.f32.mrb[3].mxu0 }
 0x31a   : > { %1893 = vpow2.f32 %v1453_v51 }
 0x322   : > { %v1892_v53 = vpop.eup %1891 }
 0x323   : > { %v764_v54 = vadd.f32 1.0, %v1892_v53 }
 0x324   : > { %v1894_v55 = vpop.eup %1893 }
 0x325   : > { %1895 = vrcp.f32 %v764_v54  ;;  %v765_v56 = vadd.f32 1.0, %v1894_v55  ;;  %v1883_v55 = vld [vmem:[#allocation6 + $0xc0] sm:$0xff]  }
 0x327   : > { %1897 = vrcp.f32 %v765_v56  ;;  %v1884_v56 = vld [vmem:[#allocation6 + $0xc8] sm:$0xff]  }
 0x32f   : > { %v1896_v57 = vpop.eup %1895 }
 0x330   : > { %v770_v58 = vmul.f32 %v1896_v57, %v751_v47  ;;  %v1885_v57 = vld [vmem:[#allocation6 + $0xd0] sm:$0xff]  }
 0x331   : > { %v1898_v59 = vpop.eup %1897 }
 0x332   : > { %v771_v60 = vmul.f32 %v1898_v59, %v754_v50  ;;  %v2358_v61 = vmul.f32 1.6666666, %v770_v58  ;;  %v1886_v58 = vld [vmem:[#allocation6 + $0xd8] sm:$0xff]   ;;  %v1887_v59 = vld [vmem:[#allocation6 + $0xe0] sm:$0xff]  }
 0x334   : > { %v2360_v62 = vmul.f32 1.6666666, %v771_v60  ;;  %v1888_v60 = vld [vmem:[#allocation6 + $0xe8] sm:$0xff]  }
 0x336   : > { %v774_v63 = vpack.c.bf16 %v2360_v62, %v2358_v61 }
 0x338   : > { %1677 = vmatmul.mubr.bf16.vlgmr.msra.gmra.mrb[0].mxu1 %v774_v63 }
 0x339   : > { %1716 = vmatprep.mubr.msk.bf16.mxu1 %vm2100_vm5, %v2099_v28  ;;  %1701 = vmatpush3.bf16.msra.mxu1 %v1875_v26 }
 0x33a   : > { %1702 = vmatprep.subr.bf16.mxu1 %v2099_v28 }
 0x33d   : > { %1703 = vmatpush3.bf16.msra.mxu1 %v1876_v27 }
 0x33e   : > { %1704 = vmatprep.subr.bf16.mxu1 %v2099_v28 }
 0x341   : > { %1705 = vmatpush3.bf16.msra.mxu1 %v1877_v10 }
 0x342   : > { %1706 = vmatprep.subr.bf16.mxu1 %v2099_v28 }
 0x345   : > { %1707 = vmatpush3.bf16.msra.mxu1 %v1878_v29 }
 0x346   : > { %1708 = vmatprep.subr.bf16.mxu1 %v2099_v28 }
 0x349   : > { %1709 = vmatpush3.bf16.msra.mxu1 %v1879_v30 }
 0x34a   : > { %1710 = vmatprep.subr.bf16.mxu1 %v2099_v28 }
 0x34d   : > { %1711 = vmatpush3.bf16.msra.mxu1 %v1880_v31 }
 0x34e   : > { %1712 = vmatprep.subr.bf16.mxu1 %v2099_v28 }
 0x351   : > { %1713 = vmatpush3.bf16.msra.mxu1 %v1881_v32 }
 0x352   : > { %1714 = vmatprep.subr.bf16.mxu1 %v2099_v28 }
 0x355   : > { %1715 = vmatpush3.bf16.msra.mxu1 %v1882_v33 }
 0x40b   : > { %v873_v8 = vpop.f32.mrb[0].mxu1 }
 0x40c   : > { %v1462_v9 = vmul.f32 -1.442695, %v873_v8  ;;  %v1678_v11 = vpop.f32.mrb[1].mxu1 }
 0x40d   : > { %v876_v12 = vpop.f32.mrb[2].mxu1 }
 0x40e   : > { %1899 = vpow2.f32 %v1462_v9  ;;  %v1463_v13 = vmul.f32 -1.442695, %v876_v12  ;;  %v1679_v14 = vpop.f32.mrb[3].mxu1 }
 0x410   : > { %1901 = vpow2.f32 %v1463_v13 }
 0x418   : > { %v1900_v15 = vpop.eup %1899 }
 0x419   : > { %v886_v16 = vadd.f32 1.0, %v1900_v15 }
 0x41a   : > { %v1902_v17 = vpop.eup %1901 }
 0x41b   : > { %1903 = vrcp.f32 %v886_v16  ;;  %v887_v18 = vadd.f32 1.0, %v1902_v17 }
 0x41d   : > { %1905 = vrcp.f32 %v887_v18 }
 0x425   : > { %v1904_v19 = vpop.eup %1903 }
 0x426   : > { %v892_v20 = vmul.f32 %v1904_v19, %v873_v8 }
 0x427   : > { %v1906_v21 = vpop.eup %1905 }
 0x428   : > { %v893_v22 = vmul.f32 %v1906_v21, %v876_v12  ;;  %v894_v23 = vmul.f32 1.6666666, %v892_v20 }
 0x42a   : > { %v895_v24 = vmul.f32 1.6666666, %v893_v22 }
 0x42c   : > { %v896_v25 = vpack.c.bf16 %v895_v24, %v894_v23 }
 0x42e   : > { %1697 = vmatmul.mubr.bf16.vlgmr.msra.gmra.mrb[4].mxu0 %v896_v25 }
 0x42f   : > { %1736 = vmatprep.mubr.msk.bf16.mxu0 %vm2100_vm5, %v2099_v28  ;;  %1721 = vmatpush3.bf16.msra.mxu0 %v1883_v55 }
 0x430   : > { %1722 = vmatprep.subr.bf16.mxu0 %v2099_v28 }
 0x433   : > { %1723 = vmatpush3.bf16.msra.mxu0 %v1884_v56 }
 0x434   : > { %1724 = vmatprep.subr.bf16.mxu0 %v2099_v28 }
 0x437   : > { %1725 = vmatpush3.bf16.msra.mxu0 %v1885_v57 }
 0x438   : > { %1726 = vmatprep.subr.bf16.mxu0 %v2099_v28 }
 0x43b   : > { %1727 = vmatpush3.bf16.msra.mxu0 %v1886_v58 }
 0x43c   : > { %1728 = vmatprep.subr.bf16.mxu0 %v2099_v28 }
 0x43f   : > { %1729 = vmatpush3.bf16.msra.mxu0 %v1887_v59 }
 0x440   : > { %1730 = vmatprep.subr.bf16.mxu0 %v2099_v28 }
 0x443   : > { %1731 = vmatpush3.bf16.msra.mxu0 %v1888_v60 }
 0x444   : > { %1732 = vmatprep.subr.bf16.mxu0 %v2099_v28 }
 0x501   : > { %v996_v34 = vpop.f32.mrb[4].mxu0 }
 0x502   : > { %v1472_v35 = vmul.f32 -1.442695, %v996_v34  ;;  %v1698_v36 = vpop.f32.mrb[5].mxu0 }
 0x503   : > { %v999_v37 = vpop.f32.mrb[6].mxu0 }
 0x504   : > { %1907 = vpow2.f32 %v1472_v35  ;;  %v1473_v38 = vmul.f32 -1.442695, %v999_v37  ;;  %v1699_v39 = vpop.f32.mrb[7].mxu0 }
 0x506   : > { %1909 = vpow2.f32 %v1473_v38 }
 0x50e   : > { %v1908_v40 = vpop.eup %1907 }
 0x50f   : > { %v1009_v41 = vadd.f32 1.0, %v1908_v40 }
 0x510   : > { %v1910_v42 = vpop.eup %1909 }
 0x511   : > { %1911 = vrcp.f32 %v1009_v41  ;;  %v1010_v43 = vadd.f32 1.0, %v1910_v42 }
 0x513   : > { %1913 = vrcp.f32 %v1010_v43 }
 0x51b   : > { %v1912_v44 = vpop.eup %1911 }
 0x51c   : > { %v1015_v45 = vmul.f32 %v1912_v44, %v996_v34 }
 0x51d   : > { %v1914_v46 = vpop.eup %1913 }
 0x51e   : > { %v1017_v47 = vmul.f32 1.6666666, %v1015_v45  ;;  %v1016_v48 = vmul.f32 %v1914_v46, %v999_v37 }
 0x520   : > { %v1019_v49 = vadd.f32 %v1017_v47, %v2358_v61  ;;  %v1018_v50 = vmul.f32 1.6666666, %v1016_v48  ;;  %v1889_v61 = vld [vmem:[#allocation6 + $0xf0] sm:$0xff]  }
 0x521   : > { %1733 = vmatpush3.bf16.msra.mxu0 %v1889_v61 }
 0x522   : > { %v1020_v51 = vadd.f32 %v1018_v50, %v2360_v62  ;;  %v2385_v52 = vmul.f32 0.70710677, %v1019_v49  ;;  %1734 = vmatprep.subr.bf16.mxu0 %v2099_v28  ;;  %v1890_v62 = vld [vmem:[#allocation6 + $0xf8] sm:$0xff]  }
 0x524   : > { %v2387_v53 = vmul.f32 0.70710677, %v1020_v51 }
 0x525   : > { %1735 = vmatpush3.bf16.msra.mxu0 %v1890_v62 }
 0x526   : > { %v1023_v54 = vpack.c.bf16 %v2387_v53, %v2385_v52 }
 0x528   : > { %1717 = vmatmul.mubr.bf16.vlgmr.msra.gmra.mrb[4].mxu1 %v1023_v54 }
 0x5fb   : > { %v1123_v63 = vpop.f32.mrb[4].mxu1 }
 0x5fc   : > { %v1482_v0 = vmul.f32 -1.442695, %v1123_v63  ;;  %v1718_v1 = vpop.f32.mrb[5].mxu1 }
 0x5fd   : > { %v1126_v2 = vpop.f32.mrb[6].mxu1 }
 0x5fe   : > { %1915 = vpow2.f32 %v1482_v0  ;;  %v1483_v3 = vmul.f32 -1.442695, %v1126_v2  ;;  %v1719_v4 = vpop.f32.mrb[7].mxu1 }
 0x600   : > { %1917 = vpow2.f32 %v1483_v3 }
 0x608   : > { %v1916_v5 = vpop.eup %1915 }
 0x609   : > { %v1136_v6 = vadd.f32 1.0, %v1916_v5 }
 0x60a   : > { %v1918_v7 = vpop.eup %1917 }
 0x60b   : > { %1919 = vrcp.f32 %v1136_v6  ;;  %v1137_v8 = vadd.f32 1.0, %v1918_v7 }
 0x60d   : > { %1921 = vrcp.f32 %v1137_v8 }
 0x615   : > { %v1920_v9 = vpop.eup %1919 }
 0x616   : > { %v1142_v11 = vmul.f32 %v1920_v9, %v1123_v63 }
 0x617   : > { %v1922_v12 = vpop.eup %1921 }
 0x618   : > { %v1143_v28 = vmul.f32 %v1922_v12, %v1126_v2  ;;  %v1144_v13 = vmul.f32 1.6666666, %v1142_v11 }
 0x61a   : > { %v1145_v14 = vmul.f32 1.6666666, %v1143_v28 }
 0x61c   : > { %v1146_v15 = vpack.c.bf16 %v1145_v14, %v1144_v13 }
 0x61e   : > { %1737 = vmatmul.mubr.bf16.vlgmr.msra.gmra.mrb[8].mxu0 %v1146_v15 }
 0x6f1   : > { %v1246_v16 = vpop.f32.mrb[8].mxu0 }
 0x6f2   : > { %v1492_v17 = vmul.f32 -1.442695, %v1246_v16  ;;  %v1738_v18 = vpop.f32.mrb[9].mxu0 }
 0x6f3   : > { %v1249_v19 = vpop.f32.mrb[10].mxu0 }
 0x6f4   : > { %1923 = vpow2.f32 %v1492_v17  ;;  %v1493_v20 = vmul.f32 -1.442695, %v1249_v19  ;;  %v1739_v21 = vpop.f32.mrb[11].mxu0 }
 0x6f6   : > { %1925 = vpow2.f32 %v1493_v20 }
 0x6fe   : > { %v1924_v22 = vpop.eup %1923 }
 0x6ff   : > { %v1259_v23 = vadd.f32 1.0, %v1924_v22 }
 0x700   : > { %v1926_v24 = vpop.eup %1925 }
 0x701   : > { %1927 = vrcp.f32 %v1259_v23  ;;  %v1260_v25 = vadd.f32 1.0, %v1926_v24 }
 0x703   : > { %1929 = vrcp.f32 %v1260_v25 }
 0x70b   : > { %v1928_v26 = vpop.eup %1927 }
 0x70c   : > { %v1265_v27 = vmul.f32 %v1928_v26, %v1246_v16 }
 0x70d   : > { %v1930_v10 = vpop.eup %1929 }
 0x70e   : > { %v1267_v29 = vmul.f32 1.6666666, %v1265_v27  ;;  %v1266_v30 = vmul.f32 %v1930_v10, %v1249_v19 }
 0x710   : > { %v1269_v31 = vadd.f32 %v1267_v29, %v2385_v52  ;;  %v1268_v32 = vmul.f32 1.6666666, %v1266_v30 }
 0x712   : > { %v1271_v33 = vmul.f32 0.70710677, %v1269_v31  ;;  %v1270_v34 = vadd.f32 %v1268_v32, %v2387_v53 }
 0x714   : > { %1273 = vst [vmem:[%s2296_s17] sm:$0xff] %v1271_v33  ;;  %v1272_v35 = vmul.f32 0.70710677, %v1270_v34 }
 0x716   : > { %1274 = vst [vmem:[%s2296_s17 + $0x8] sm:$0xff] %v1272_v35 }
 0x717 PF: > { %s1499_s24 = sshll.u32 %s2077_s25, 8  ;;  %s1289_s20 = sshll.u32 %s2296_s17, 4  ;;  %s2409_s20 = int_to_ptr.vmem [resolvable:$true] %s1289_s20 }
 0x718   : > { %s2406_s14 = scalar_lea.hbm %s2471_s6, %s1499_s24  ;;  %s2413_s29 = scalar_lea.sflag [#allocation5], %s312_s23 }
 0x719   : > { %s1987_s30 = scalar_lea.vmem %s2409_s20, 256  ;;  %p2493_p4 = scmp.ne.s32.totalorder %s2484_s10, 0 }
 0x71a   : > { %p1988_p1 = scmp.ne.s32.totalorder %s2409_s20, %s1987_s30  ;;  %s2101_s25 = smov [#allocation8]  }
 0x71b   : > { %s1991_s13 = sshll.u32 %s2101_s25, 4  ;;  %s1992_s13 = int_to_ptr.vmem [resolvable:$false] %s1991_s13 }
 0x71c   : > { %p1989_p5 = pnand %p1988_p1, %p2493_p4  ;;  %s1993_s9 = scalar_lea.vmem %s1992_s13, 512 }
 0x71d   : > { %p1994_p7 = scmp.lt.s32.totalorder %s2409_s20, %s1992_s13  ;;  %p1995_p8 = scmp.lt.s32.totalorder %s1993_s9, %s1987_s30 }
 0x71e   : > { %p1990_p6 = pneg %p1989_p5 }
 0x71f   : > { %p1996_p11 = por %p1995_p8, %p1994_p7 }
 0x721   : > { %p1997_p12 = pnand %p1996_p11, %p1990_p6 }
 0x723   : > { %2000 = shalt.err (!%p1997_p12)
}
 0x724   : > { %s2001_s23 = scalar_lea.hbm %s2406_s14, 256  ;;  %s2005_s17 = scalar_lea.hbm %s2471_s6, 768 }
 0x725   : > { %p2002_p3 = scmp.ne.s32.totalorder %s2406_s14, %s2001_s23  ;;  %p2006_p2 = scmp.lt.u32.totalorder %s2406_s14, %s2471_s6 }
 0x726   : > { %p2007_p10 = scmp.lt.u32.totalorder %s2005_s17, %s2001_s23  ;;  %p2009_p1 = scmp.lt.u32.totalorder %s2001_s23, %s2406_s14 }
 0x727   : > { %p2003_p9 = pnand %p2002_p3, %p2493_p4 }
 0x728   : > { %p2008_p13 = por %p2007_p10, %p2006_p2 }
 0x729   : > { %p2004_p0 = pneg %p2003_p9 }
 0x72a   : > { %p2010_p5 = por %p2009_p1, %p2008_p13 }
 0x72c   : > { %p2011_p6 = pnand %p2010_p5, %p2004_p0 }
 0x72e   : > { %2014 = shalt.err (!%p2011_p6)
}
 0x72f   : > { %s2102_s27 = smov 128   ;;  %s2103_s12 = smov 8  }
 0x730   : > { %1748 = dma.vmem_to_hbm [thread:$0]  (%p2493_p4), %s2409_s20, 256, %s2406_s14, %s2413_s29, %s2102_s27, %s2102_s27, %s2103_s12  }
 0x731 PF: > { %p1765_p7 = scmp.ge.s32.totalorder %s2089_s28, 2  ;;  %s1304_s18 = sand.u32 1, %s2061_s21  }
 0x732   : > { %p2494_p8 = scmp.ne.s32.totalorder %s2486_s11, 0  ;;  %s1305_s24 = scalar_lea.sflag [#allocation5], %s1304_s18 }
 0x734   : > { %p1758_p11 = pnand %p1765_p7, %p2494_p8 }
 0x736   : > { %2056 = dma.done.wait (!%p1758_p11), %s1305_s24, 256  }
 0x737   : > { %2058 = vsyncadd (!%p1758_p11), %s1305_s24, 4294967040  ;;  %s21_s28 = sadd.s32 1, %s2089_s28   ;;  %s2495_s15 = sld [smem:[#allocation12_spill]] }
 0x738   : > { %p18_p12 = scmp.ge.s32.totalorder %s21_s28, 11   ;;  %s2496_s23 = sld [smem:[#allocation17_spill]] }
 0x739   : > { %s2497_s24 = sld [smem:[#allocation13_spill]]  ;;  %s2498_s25 = sld [smem:[#allocation14_spill]] }
 0x73a   : > { %s2499_s26 = sld [smem:[#allocation15_spill]]  ;;  %s2500_s27 = sld [smem:[#allocation16_spill]] }
 0x73b   : > { %s2501_s21 = smov %s2065_s22  ;;  %20 = sbr.rel (!%p18_p12) target bundleno = 7 (0x7), region = 105 }
 0x73d   : > { %s2502_s22 = smov %s2495_s15 }
 0x742   :  { %1310 = vsyncpa [#allocation4], 1 }
 0x743   :  { %1312 = vsyncpa [#allocation4 + $0x1], 1 }
 0x744   :  { %1313 = vsyncpa [#allocation7], 1 }
 0x745   :  { %1314 = vsyncpa [#allocation5], 1 }
 0x746   :  { %1316 = vsyncpa [#allocation5 + $0x1], 1 }

</bundles_post_ra>
